<compile_context>
chip_gen: v7x
topology: tpu7x:2x2x1
jax: 0.10.0
libtpu: 0.0.40
codegen_flags: <defaults>
</compile_context>

<pallas_src>
import functools

import jax
import jax.numpy as jnp
from jax.experimental import pallas as pl
from jax.experimental.pallas import tpu as pltpu


def _round_up(x, m):
    return ((x + m - 1) // m) * m


def _pick_tile(n, align, max_tile, min_nice=256):
    """Pick (tile, padded_n): tile % align == 0, tile <= max_tile, padded_n % tile == 0.

    Prefers exact divisors of the aligned size (zero padding); falls back to the
    tile >= min_nice that minimizes padding, else the max tile."""
    n_al = _round_up(max(n, 1), align)
    max_tile = max(align, (max_tile // align) * align)
    if n_al <= max_tile:
        return n_al, n_al
    # 1) largest reasonably-sized exact divisor that is a multiple of `align`.
    t = max_tile
    while t >= align:
        if n_al % t == 0 and t >= min_nice:
            return t, n_al
        t -= align
    # 2) no nice exact divisor: minimize padding over large tiles.
    best_t, best_pad = max_tile, _round_up(n_al, max_tile)
    t = max_tile
    while t >= max(align, min_nice):
        padded = _round_up(n_al, t)
        if padded < best_pad or (padded == best_pad and t > best_t):
            best_t, best_pad = t, padded
        t -= align
    return best_t, best_pad


def _vmem_budget_bytes():
    """Usable VMEM budget for this kernel (device-aware, with headroom)."""
    cap = 64 << 20  # v7x per-TensorCore VMEM (smallest across v5e/v6e/v7x)
    try:
        info = pltpu.get_tpu_info()
        cap = int(getattr(info, "vmem_capacity_bytes", cap))
    except Exception:
        pass
    return max(32 << 20, min(cap - (12 << 20), 100 << 20))


def _conv1d_fullk_kernel(x_ref, w_ref, b_ref, o_ref):
    # x_ref: (tm, nx)  w_ref: (nx, tn)  b_ref: (1, tn)  o_ref: (tm, tn)
    acc = jnp.dot(x_ref[...], w_ref[...], preferred_element_type=jnp.float32)
    o_ref[...] = (acc + b_ref[...].astype(jnp.float32)).astype(o_ref.dtype)


def _conv1d_ktiled_kernel(x_ref, w_ref, b_ref, o_ref, acc_ref):
    # x_ref: (tm, tk)  w_ref: (tk, tn)  b_ref: (1, tn)  o_ref/acc_ref: (tm, tn)
    k = pl.program_id(2)
    prod = jnp.dot(x_ref[...], w_ref[...], preferred_element_type=jnp.float32)

    @pl.when(k == 0)
    def _():
        acc_ref[...] = prod          # first step: write, no zero-fill + RMW

    @pl.when(k > 0)
    def _():
        acc_ref[...] += prod

    @pl.when(k == pl.num_programs(2) - 1)
    def _():
        o_ref[...] = (acc_ref[...] + b_ref[...].astype(jnp.float32)).astype(o_ref.dtype)


@functools.partial(
    jax.jit,
    static_argnames=("tm_max", "tn_max", "tk_max", "compute_dtype", "prefer_full_k"),
)
def conv1d(x, weight, bias, *, tm_max=512, tn_max=1024, tk_max=1024,
           compute_dtype=None, prefer_full_k=True):
    """GPT-2 Conv1D forward: y = x @ weight + bias over the last dim."""
    nx, nf = weight.shape
    assert x.shape[-1] == nx
    lead_shape = x.shape[:-1]
    out_dtype = x.dtype

    x2d = x.reshape(-1, nx)
    m = x2d.shape[0]

    # Optional mixed precision: bf16 operands -> full-rate MXU on v6e/v7x,
    # accumulation/bias add stay f32, output keeps the original dtype.
    if compute_dtype is not None:
        x2d = x2d.astype(compute_dtype)
        weight = weight.astype(compute_dtype)
    op_it = jnp.dtype(x2d.dtype).itemsize
    o_it = jnp.dtype(out_dtype).itemsize
    b_it = jnp.dtype(bias.dtype).itemsize

    # ---------------- tile selection -----------------------------------------
    tm_max = max(8, (tm_max // 8) * 8)
    tm = min(tm_max, _round_up(m, 8))
    m_pad = _round_up(m, tm)
    tn, nf_pad = _pick_tile(nf, 128, tn_max)

    budget = _vmem_budget_bytes()

    # Full-K footprint: double-buffered x/w/bias/out tiles + f32 dot temporary.
    fullk_bytes = (2 * (tm * nx + nx * tn) * op_it
                   + 2 * tn * b_it
                   + 2 * tm * tn * o_it
                   + tm * tn * 4)
    use_full_k = prefer_full_k and (fullk_bytes + (4 << 20) <= budget)

    if use_full_k:
        tk = nx
        nx_pad = nx          # no K padding at all
    else:
        tk, nx_pad = _pick_tile(nx, 128, tk_max)

    # ---------------- pad operands (no-op for 128-multiple widths) -----------
    if m_pad != m or nx_pad != nx:
        x2d = jnp.pad(x2d, ((0, m_pad - m), (0, nx_pad - nx)))
    w_p = weight
    if nx_pad != nx or nf_pad != nf:
        w_p = jnp.pad(weight, ((0, nx_pad - nx), (0, nf_pad - nf)))
    b_p = bias.reshape(1, nf)
    if nf_pad != nf:
        b_p = jnp.pad(b_p, ((0, 0), (0, nf_pad - nf)))

    gm = m_pad // tm
    gn = nf_pad // tn

    # ---------------- build pallas_call --------------------------------------
    if use_full_k:
        x_bytes = m_pad * nx_pad * op_it
        w_bytes = nx_pad * nf_pad * op_it
        # Choose grid ordering so the cheaper re-stream is the one we pay for.
        i_outer = (x_bytes + gm * w_bytes) <= (w_bytes + gn * x_bytes)
        if i_outer:
            grid = (gm, gn)
            x_map = lambda i, j: (i, 0)
            w_map = lambda i, j: (0, j)
            b_map = lambda i, j: (0, j)
            o_map = lambda i, j: (i, j)
            bytes_accessed = (x_bytes + gm * w_bytes + gm * nf_pad * b_it
                              + m_pad * nf_pad * o_it)
        else:
            grid = (gn, gm)
            x_map = lambda j, i: (i, 0)
            w_map = lambda j, i: (0, j)
            b_map = lambda j, i: (0, j)
            o_map = lambda j, i: (i, j)
            bytes_accessed = (w_bytes + gn * x_bytes + nf_pad * b_it
                              + m_pad * nf_pad * o_it)

        kernel = _conv1d_fullk_kernel
        in_specs = [
            pl.BlockSpec((tm, nx_pad), x_map),
            pl.BlockSpec((nx_pad, tn), w_map),
            pl.BlockSpec((1, tn), b_map),
        ]
        out_specs = pl.BlockSpec((tm, tn), o_map)
        scratch_shapes = []
        dim_sem = ("parallel", "parallel")
        footprint = fullk_bytes
    else:
        gk = nx_pad // tk
        grid = (gm, gn, gk)
        kernel = _conv1d_ktiled_kernel
        in_specs = [
            pl.BlockSpec((tm, tk), lambda i, j, k: (i, k)),
            pl.BlockSpec((tk, tn), lambda i, j, k: (k, j)),
            pl.BlockSpec((1, tn), lambda i, j, k: (0, j)),
        ]
        out_specs = pl.BlockSpec((tm, tn), lambda i, j, k: (i, j))
        scratch_shapes = [pltpu.VMEM((tm, tn), jnp.float32)]
        dim_sem = ("parallel", "parallel", "arbitrary")
        footprint = (2 * (tm * tk + tk * tn) * op_it + 2 * tn * b_it
                     + 2 * tm * tn * o_it + tm * tn * 4)
        bytes_accessed = (gn * m_pad * nx_pad * op_it
                          + gm * nx_pad * nf_pad * op_it
                          + gm * nf_pad * b_it
                          + m_pad * nf_pad * o_it)

    vmem_limit = int(min(budget, max(32 << 20, footprint + (8 << 20))))

    cost = pl.CostEstimate(
        flops=int(2 * m_pad * nx_pad * nf_pad),
        bytes_accessed=int(bytes_accessed),
        transcendentals=0,
    )

    out = pl.pallas_call(
        kernel,
        out_shape=jax.ShapeDtypeStruct((m_pad, nf_pad), out_dtype),
        grid_spec=pltpu.PrefetchScalarGridSpec(
            num_scalar_prefetch=0,
            grid=grid,
            in_specs=in_specs,
            out_specs=out_specs,
            scratch_shapes=scratch_shapes,
        ),
        compiler_params=pltpu.CompilerParams(
            dimension_semantics=dim_sem,
            vmem_limit_bytes=vmem_limit,
        ),
        cost_estimate=cost,
    )(x2d, w_p, b_p)

    if m_pad != m or nf_pad != nf:
        out = out[:m, :nf]
    return out.reshape(*lead_shape, nf)


if __name__ == "__main__":
    key = jax.random.PRNGKey(0)
    k_x, k_w, _ = jax.random.split(key, 3)

    # 1) Small shape consistent with the module: batch=2, seq=8, nx=32, nf=64.
    batch, seq, nx, nf = 2, 8, 32, 64
    x = jax.random.normal(k_x, (batch, seq, nx), dtype=jnp.float32)
    weight = 0.02 * jax.random.normal(k_w, (nx, nf), dtype=jnp.float32)  # std=0.02 init
    bias = jnp.zeros((nf,), dtype=jnp.float32)
    y = conv1d(x, weight, bias)
    jax.block_until_ready(y)
    y_ref = (x.reshape(-1, nx) @ weight + bias).reshape(batch, seq, nf)
    assert y.shape == (batch, seq, nf)
    assert jnp.allclose(y, y_ref, atol=1e-5, rtol=1e-5)

    # 2) Ragged multi-128-lane shape (non-divisible M, nf, nx) -> full-K path.
    b2, s2, nx2, nf2 = 3, 37, 160, 200
    x2 = jax.random.normal(k_x, (b2, s2, nx2), dtype=jnp.float32)
    w2 = 0.02 * jax.random.normal(k_w, (nx2, nf2), dtype=jnp.float32)
    bias2 = 0.1 * jnp.arange(nf2, dtype=jnp.float32)
    y2 = conv1d(x2, w2, bias2)
    jax.block_until_ready(y2)
    y2_ref = (x2.reshape(-1, nx2) @ w2 + bias2).reshape(b2, s2, nf2)
    assert jnp.allclose(y2, y2_ref, atol=1e-4, rtol=1e-4)

    # 3) Force the K-tiled fallback (multi-step K, accumulator scratch, pl.when paths).
    b3, s3, nx3, nf3 = 2, 16, 384, 256
    x3 = jax.random.normal(k_x, (b3, s3, nx3), dtype=jnp.float32)
    w3 = 0.02 * jax.random.normal(k_w, (nx3, nf3), dtype=jnp.float32)
    bias3 = 0.05 * jnp.arange(nf3, dtype=jnp.float32)
    y3 = conv1d(x3, w3, bias3, tm_max=16, tn_max=128, tk_max=128, prefer_full_k=False)
    jax.block_until_ready(y3)
    y3_ref = (x3.reshape(-1, nx3) @ w3 + bias3).reshape(b3, s3, nf3)
    assert jnp.allclose(y3, y3_ref, atol=1e-4, rtol=1e-4)

    # 4) bf16 compute path (f32 in/out, bf16 MXU operands, f32 accumulation).
    y4 = conv1d(x2, w2, bias2, compute_dtype=jnp.bfloat16)
    jax.block_until_ready(y4)
    assert jnp.allclose(y4, y2_ref, atol=3e-2, rtol=3e-2)

    print("KERNEL_OK")
</pallas_src>

<mosaic_0001>
module attributes {stable_mosaic.version = 11 : i64} {
  func.func @_conv1d_fullk_kernel(%arg0: i32, %arg1: i32, %arg2: memref<16x32xf32, #tpu.memory_space<vmem>>, %arg3: memref<32x128xf32, #tpu.memory_space<vmem>>, %arg4: memref<1x128xf32, #tpu.memory_space<vmem>>, %arg5: memref<16x128xf32, #tpu.memory_space<vmem>>) attributes {dimension_semantics = [#tpu.dimension_semantics<parallel>, #tpu.dimension_semantics<parallel>], iteration_bounds = array<i64: 1, 1>, scalar_prefetch = 0 : i64, scratch_operands = 0 : i64, tpu.core_type = #tpu.core_type<tc>, window_params = [{transform_indices = @transform_0, window_bounds = array<i64: 16, 32>}, {transform_indices = @transform_1, window_bounds = array<i64: 32, 128>}, {transform_indices = @transform_2, window_bounds = array<i64: 1, 128>}, {transform_indices = @transform_3, window_bounds = array<i64: 16, 128>}]} {
    %c0 = arith.constant 0 : index
    %c0_0 = arith.constant 0 : index
    %0 = vector.load %arg2[%c0, %c0_0] : memref<16x32xf32, #tpu.memory_space<vmem>>, vector<16x32xf32>
    %c0_1 = arith.constant 0 : index
    %c0_2 = arith.constant 0 : index
    %1 = vector.load %arg3[%c0_1, %c0_2] : memref<32x128xf32, #tpu.memory_space<vmem>>, vector<32x128xf32>
    %cst = arith.constant dense<0.000000e+00> : vector<16x128xf32>
    %2 = tpu.matmul %0, %1, %cst {dimension_numbers = #tpu.dot_dimension_numbers<[1], [0], [0], [1], [0, 0, 1, 1], [], []>} : vector<16x32xf32>, vector<32x128xf32>, vector<16x128xf32> -> vector<16x128xf32>
    %c0_3 = arith.constant 0 : index
    %c0_4 = arith.constant 0 : index
    %3 = vector.load %arg4[%c0_3, %c0_4] : memref<1x128xf32, #tpu.memory_space<vmem>>, vector<1x128xf32>
    %4 = vector.broadcast %3 : vector<1x128xf32> to vector<16x128xf32>
    %5 = arith.addf %2, %4 : vector<16x128xf32>
    %c0_5 = arith.constant 0 : index
    %c0_6 = arith.constant 0 : index
    %6 = vector.load %arg5[%c0_5, %c0_6] : memref<16x128xf32, #tpu.memory_space<vmem>>, vector<16x128xf32>
    tpu.vector_store %arg5[%c0_5, %c0_6], %5 {strides = array<i32>} : memref<16x128xf32, #tpu.memory_space<vmem>>, vector<16x128xf32>,
    return
  }
  func.func @transform_0(%arg0: i32, %arg1: i32) -> (i32, i32) {
    %c0_i32 = arith.constant 0 : i32
    %c0_i32_0 = arith.constant 0 : i32
    return %arg0, %c0_i32 : i32, i32
  }
  func.func @transform_1(%arg0: i32, %arg1: i32) -> (i32, i32) {
    %c0_i32 = arith.constant 0 : i32
    %c0_i32_0 = arith.constant 0 : i32
    return %c0_i32, %arg1 : i32, i32
  }
  func.func @transform_2(%arg0: i32, %arg1: i32) -> (i32, i32) {
    %c0_i32 = arith.constant 0 : i32
    %c0_i32_0 = arith.constant 0 : i32
    return %c0_i32, %arg1 : i32, i32
  }
  func.func @transform_3(%arg0: i32, %arg1: i32) -> (i32, i32) {
    %c0_i32 = arith.constant 0 : i32
    return %arg0, %arg1 : i32, i32
  }
}

</mosaic_0001>

<bundles_post_ra>
// kernel: conv1d.1
= control target key start
LH: loop header
LB: loop body
LE: loop exit
PB: predicated region body
PF: predicated region fallthrough
CT: control target
= control target key end

     0   :  { %vm27_vm0 = vcmask 261120   ;;  %s190_s1 = inlined_call_operand.vmem [shape: f32[32,128], index: 1, kind: input, shape index: {}]   ;;  %s191_s0 = inlined_call_operand.vmem [shape: f32[16,32], index: 0, kind: input, shape index: {}]   ;;  %s192_s2 = inlined_call_operand.vmem [shape: f32[1,128], index: 2, kind: input, shape index: {}]   ;;  %s193_s3 = inlined_call_operand.vmem [shape: f32[16,128], index: 3, kind: output, shape index: {}]  }
   0x1   :  { %v16_v0 = vld [vmem:[%s190_s1] sm:$0xff]  ;;  %v17_v1 = vld [vmem:[%s190_s1 + $0x8] sm:$0xff]  ;;  %v18_v2 = vld [vmem:[%s190_s1 + $0x10] sm:$0xff] }
   0x2   :  { %v135_v3 = vpack.c.bf16 %v17_v1, %v16_v0  ;;  %v19_v4 = vld [vmem:[%s190_s1 + $0x18] sm:$0xff]  ;;  %v14_v5 = vld [vmem:[%s191_s0] sm:$0xff]  ;;  %v15_v7 = vld [vmem:[%s191_s0 + $0x8] sm:$0xff] }
   0x3   :  { %v139_v6 = vpack.c.bf16 %v19_v4, %v18_v2  ;;  %132 = vmatprep.mubr.msk.f32.mxu0 %vm27_vm0, %v14_v5  ;;  %v115_v8 = vld [vmem:[%s192_s2] ss:$0 sm:$0xff] }
   0x4   :  { %136 = vmatprep.subr.bf16.mxu0 %v135_v3 }
   0x5   :  { %138 = vmatpush3.bf16.msra.mxu0 %v135_v3 }
   0x6   :  { %140 = vmatprep.subr.bf16.mxu0 %v139_v6 }
   0x9   :  { %142 = vmatpush3.bf16.msra.mxu0 %v139_v6 }
   0xc   :  { %133 = vmatmul.mubr.msk.f32.vlgmr.msra.gmra.mrb[0].mxu0 %vm27_vm0, %v15_v7 }
  0xdf   :  { %v134_v9 = vpop.f32.mrb[0].mxu0 }
  0xe0   :  { %v106_v10 = vadd.f32 %v134_v9, %v115_v8  ;;  %v100_v11 = vpop.f32.mrb[1].mxu0 }
  0xe1   :  { %v101_v12 = vadd.f32 %v115_v8, %v100_v11 }
  0xe2   :  { %110 = vst [vmem:[%s193_s3 + $0x8] sm:$0xff] %v106_v10 }
  0xe3   :  { %109 = vst [vmem:[%s193_s3] sm:$0xff] %v101_v12 }

</bundles_post_ra>
